<compile_context>
chip_gen: v7x
topology: tpu7x:2x2x1
jax: 0.10.0
libtpu: 0.0.40
codegen_flags: <defaults>
</compile_context>

<pallas_src>
import jax
import jax.numpy as jnp
from jax.experimental import pallas as pl
from jax.experimental.pallas import tpu as pltpu


def _pos_emb_kernel(freq_ref, x_ref, out_ref):
    # freq_ref: SMEM (num_freqs,) scalar-prefetched frequency bands
    # x_ref:    VMEM (1, TR, 128)    input tile (resident across freq axis)
    # out_ref:  VMEM (1, 2, TR, 128) [sin, cos] slab for this frequency
    f = freq_ref[pl.program_id(2)]
    xf = x_ref[0] * f
    out_ref[0, 0] = jnp.sin(xf)
    out_ref[0, 1] = jnp.cos(xf)


def pos_embedding(x, num_freqs=16, log_sampling=True):
    """x: (N, C, H, W) float32 -> (N, C*num_freqs*2, H, W)."""
    N, C, H, W = x.shape
    F = num_freqs
    P = C * H * W

    max_freq = num_freqs - 1
    if log_sampling:
        freq_bands = 2.0 ** jnp.linspace(0.0, float(max_freq), num_freqs,
                                         dtype=jnp.float32)
    else:
        freq_bands = jnp.linspace(2.0 ** 0.0, 2.0 ** max_freq, num_freqs,
                                  dtype=jnp.float32)

    # Fold each image to a lane-dense (R, 128) slab.  Pad the flat length up to
    # a multiple of 128 if needed (padding is sliced off after the kernel).
    LANE = 128
    P_pad = ((P + LANE - 1) // LANE) * LANE
    x_flat = x.reshape(N, P)
    if P_pad != P:
        x_flat = jnp.pad(x_flat, ((0, 0), (0, P_pad - P)))
    R = P_pad // LANE
    x3 = x_flat.reshape(N, R, LANE)

    # Row-tile size: big lane/sublane-dense blocks to amortize per-step
    # overhead; ~2 MiB output tile, ~6 MiB total VMEM with double buffering.
    TR = min(2048, R)
    grid = (N, pl.cdiv(R, TR), F)

    out4 = pl.pallas_call(
        _pos_emb_kernel,
        out_shape=jax.ShapeDtypeStruct((N, 2 * F, R, LANE), x.dtype),
        grid_spec=pltpu.PrefetchScalarGridSpec(
            num_scalar_prefetch=1,
            grid=grid,
            in_specs=[
                # Input tile index does not depend on f -> stays resident
                # across the innermost ("arbitrary") freq axis.
                pl.BlockSpec((1, TR, LANE), lambda n, r, f, freqs: (n, r, 0)),
            ],
            out_specs=pl.BlockSpec((1, 2, TR, LANE),
                                   lambda n, r, f, freqs: (n, f, r, 0)),
        ),
        compiler_params=pltpu.CompilerParams(
            dimension_semantics=("parallel", "parallel", "arbitrary")),
    )(freq_bands, x3)

    # (N, 2F, R, 128) -> (N, 2F, P) -> (N, 2F*C, H, W): contiguous reshapes
    # only (channel block 2f+s already holds C*H*W contiguous elements in
    # torch.cat order), so no transpose / extra HBM pass.
    out = out4.reshape(N, 2 * F, P_pad)
    if P_pad != P:
        out = out[:, :, :P]
    return out.reshape(N, 2 * F * C, H, W)


def _reference(x, num_freqs=16, log_sampling=True):
    max_freq = num_freqs - 1
    if log_sampling:
        freq_bands = 2.0 ** jnp.linspace(0.0, float(max_freq), num_freqs,
                                         dtype=jnp.float32)
    else:
        freq_bands = jnp.linspace(2.0 ** 0.0, 2.0 ** max_freq, num_freqs,
                                  dtype=jnp.float32)
    outs = []
    for f in freq_bands:
        outs.append(jnp.sin(x * f))
        outs.append(jnp.cos(x * f))
    return jnp.concatenate(outs, axis=1)


if __name__ == "__main__":
    key = jax.random.PRNGKey(0)
    # N=2, input_dim=2 (module default), spatial 16x16
    x = jax.random.normal(key, (2, 2, 16, 16), dtype=jnp.float32)

    out = pos_embedding(x, num_freqs=16, log_sampling=True)
    out = jax.block_until_ready(out)

    ref = _reference(x, num_freqs=16, log_sampling=True)
    assert out.shape == ref.shape == (2, 2 * 16 * 2, 16, 16)
    assert jnp.allclose(out, ref, atol=1e-4, rtol=1e-4)

    print("KERNEL_OK")
</pallas_src>

<mosaic_0001>
module attributes {stable_mosaic.version = 11 : i64} {
  func.func @_pos_emb_kernel(%arg0: i32, %arg1: i32, %arg2: i32, %arg3: memref<16xf32, #tpu.memory_space<smem>>, %arg4: memref<1x4x128xf32, #tpu.memory_space<vmem>>, %arg5: memref<1x2x4x128xf32, #tpu.memory_space<vmem>>) attributes {dimension_semantics = [#tpu.dimension_semantics<parallel>, #tpu.dimension_semantics<parallel>, #tpu.dimension_semantics<arbitrary>], iteration_bounds = array<i64: 2, 1, 16>, scalar_prefetch = 1 : i64, scratch_operands = 0 : i64, tpu.core_type = #tpu.core_type<tc>, window_params = [{transform_indices = @transform_0, window_bounds = array<i64: 1, 4, 128>}, {transform_indices = @transform_1, window_bounds = array<i64: 1, 2, 4, 128>}]} {
    %0 = arith.index_cast %arg2 : i32 to index
    %1 = memref.load %arg3[%0] : memref<16xf32, #tpu.memory_space<smem>>
    %c0 = arith.constant 0 : index
    %c0_0 = arith.constant 0 : index
    %c0_1 = arith.constant 0 : index
    %2 = vector.load %arg4[%c0, %c0_0, %c0_1] : memref<1x4x128xf32, #tpu.memory_space<vmem>>, vector<1x4x128xf32>
    %3 = vector.shape_cast %2 : vector<1x4x128xf32> to vector<4x128xf32>
    %4 = vector.broadcast %1 : f32 to vector<4x128xf32>
    %5 = arith.mulf %3, %4 : vector<4x128xf32>
    %6 = math.sin %5 : vector<4x128xf32>
    %c0_2 = arith.constant 0 : index
    %c0_3 = arith.constant 0 : index
    %c0_4 = arith.constant 0 : index
    %c0_5 = arith.constant 0 : index
    %7 = vector.load %arg5[%c0_2, %c0_3, %c0_4, %c0_5] : memref<1x2x4x128xf32, #tpu.memory_space<vmem>>, vector<1x1x4x128xf32>
    %8 = vector.shape_cast %7 : vector<1x1x4x128xf32> to vector<4x128xf32>
    %9 = vector.shape_cast %6 : vector<4x128xf32> to vector<1x1x4x128xf32>
    tpu.vector_store %arg5[%c0_2, %c0_3, %c0_4, %c0_5], %9 {strides = array<i32>} : memref<1x2x4x128xf32, #tpu.memory_space<vmem>>, vector<1x1x4x128xf32>,
    %10 = math.cos %5 : vector<4x128xf32>
    %c0_6 = arith.constant 0 : index
    %c1 = arith.constant 1 : index
    %c0_7 = arith.constant 0 : index
    %c0_8 = arith.constant 0 : index
    %11 = vector.load %arg5[%c0_6, %c1, %c0_7, %c0_8] : memref<1x2x4x128xf32, #tpu.memory_space<vmem>>, vector<1x1x4x128xf32>
    %12 = vector.shape_cast %11 : vector<1x1x4x128xf32> to vector<4x128xf32>
    %13 = vector.shape_cast %10 : vector<4x128xf32> to vector<1x1x4x128xf32>
    tpu.vector_store %arg5[%c0_6, %c1, %c0_7, %c0_8], %13 {strides = array<i32>} : memref<1x2x4x128xf32, #tpu.memory_space<vmem>>, vector<1x1x4x128xf32>,
    return
  }
  func.func @transform_0(%arg0: i32, %arg1: i32, %arg2: i32, %arg3: memref<16xf32, #tpu.memory_space<smem>>) -> (i32, i32, i32) {
    %c0_i32 = arith.constant 0 : i32
    %c0_i32_0 = arith.constant 0 : i32
    return %arg0, %arg1, %c0_i32 : i32, i32, i32
  }
  func.func @transform_1(%arg0: i32, %arg1: i32, %arg2: i32, %arg3: memref<16xf32, #tpu.memory_space<smem>>) -> (i32, i32, i32, i32) {
    %c0_i32 = arith.constant 0 : i32
    %c0_i32_0 = arith.constant 0 : i32
    return %arg0, %arg2, %arg1, %c0_i32 : i32, i32, i32, i32
  }
}

</mosaic_0001>

<bundles_post_ra>
// kernel: tpu_custom_call.1
= control target key start
LH: loop header
LB: loop body
LE: loop exit
PB: predicated region body
PF: predicated region fallthrough
CT: control target
= control target key end

     0   :  { %s1081_s0 = inlined_call_operand.hbm [shape: f32[16], index: 0, kind: input, shape index: {}]   ;;  %s1082_s1 = inlined_call_operand.hbm [shape: f32[2,4,128], index: 1, kind: input, shape index: {}]   ;;  %s1083_s2 = inlined_call_operand.hbm [shape: f32[2,32,4,128], index: 2, kind: output, shape index: {}]  }
   0x1   :  { %s630_s11 = scalar_lea.hbm %s1081_s0, 16 }
   0x2   :  { %p631_p0 = scmp.ne.s32.totalorder %s1081_s0, %s630_s11  ;;  %p634_p1 = scmp.lt.u32.totalorder %s630_s11, %s1081_s0 }
   0x4   :  { %p636_p2 = pnand %p634_p1, %p631_p0 }
   0x6   :  { %639 = shalt.err (!%p636_p2)  }
   0x7   :  { %s796_s16 = smov [#allocation3]  }
   0x8   :  { %8 = dma.hbm_to_smem %s1081_s0, 16, %s796_s16, [#allocation2] }
   0x9   :  { %742 = dma.done.wait [#allocation2], 16 }
   0xa   :  { %743 = vsyncadd [#allocation2], 4294967280 }
   0xb   :  { %10 = sfence }
   0xc   :  { %11 = vsyncpa [#allocation5], 0 }
   0xd   :  { %13 = vsyncpa [#allocation5 + $0x1], 0 }
   0xe   :  { %14 = vsyncpa [#allocation6], 0 }
   0xf   :  { %16 = vsyncpa [#allocation6 + $0x1], 0  ;;  %s834_s19 = smov 0   ;;  %s836_s20 = smov 0  }
  0x10   :  { %s838_s21 = smov 0   ;;  %s840_s22 = smov 0  }
  0x11   :  { %s842_s23 = smov 0   ;;  %s844_s24 = smov 0  }
  0x12   :  { %s846_s0 = smov 0   ;;  %s848_s25 = smov 0  }
  0x13   :  { %s850_s26 = smov 0   ;;  %s852_s27 = smov 0  }
  0x14   :  { %s854_s28 = smov 0  }
  0x15 LB: > { %s487_s29 = sadd.s32 4294967295, %s794_s28   ;;  %s488_s30 = sadd.s32 4294967294, %s794_s28   ;;  %s794_s28 = sphi %s854_s28, %s22_s28   ;;  %s790_s27 = sphi %s852_s27, %s1103_s27   ;;  %s786_s26 = sphi %s850_s26, %s1102_s26   ;;  %s782_s25 = sphi %s848_s25, %s1101_s25   ;;  %s778_s0 = sphi %s846_s0, %s1100_s0   ;;  %s774_s24 = sphi %s844_s24, %s1099_s24   ;;  %s770_s23 = sphi %s842_s23, %s1098_s23   ;;  %s766_s22 = sphi %s840_s22, %s1097_s22   ;;  %s762_s21 = sphi %s838_s21, %s1096_s21   ;;  %s758_s20 = sphi %s836_s20, %s1095_s20   ;;  %s754_s19 = sphi %s834_s19, %s1094_s19  }
  0x16   : > { %s34_s3 = sadd.s32 1, %s786_s26  ;;  %s41_s4 = sadd.s32 1, %s790_s27 }
  0x17   : > { %p35_p3 = scmp.ge.s32.totalorder %s34_s3, 16  ;;  %s50_s5 = sadd.s32 1, %s774_s24 }
  0x18   : > { %p57_p4 = scmp.ne.s32.totalorder %s774_s24, %s770_s23  ;;  %p58_p5 = scmp.eq.s32.totalorder %s794_s28, 0 }
  0x19   : > { %s1105_s3 = smov (%p35_p3, %s34_s3), 0  ;;  %s1107_s4 = smov (!%p35_p3, %s41_s4), %s790_s27 }
  0x1a   : > { %p898_p6 = por %p58_p5, %p57_p4  ;;  %p63_p7 = scmp.ne.s32.totalorder %s770_s23, %s766_s22 }
  0x1b   : > { %p43_p8 = scmp.ge.s32.totalorder %s1107_s4, 2  ;;  %p64_p9 = scmp.eq.s32.totalorder %s487_s29, 0 }
  0x1c   : > { %s74_s7 = ssub.s32 %s786_s26, %s1105_s3  ;;  %s80_s8 = sadd.s32 1, %s762_s21 }
  0x1d   : > { %s1109_s4 = smov (%p43_p8, %s1107_s4), 0  ;;  %p908_p10 = por %p64_p9, %p63_p7 }
  0x1e   : > { %p90_p11 = scmp.ne.s32.totalorder %s762_s21, %s758_s20  ;;  %s45_s10 = ssub.s32 %s790_s27, %s1109_s4 }
  0x1f   : > { %p91_p12 = scmp.eq.s32.totalorder %s487_s29, 31  ;;  %p48_p13 = scmp.eq.s32.totalorder %s45_s10, 0 }
  0x20   : > { %s75_s11 = sor.u32 %s74_s7, %s45_s10  ;;  %p96_p2 = scmp.ne.s32.totalorder %s758_s20, %s754_s19 }
  0x21   : > { %p78_p0 = scmp.eq.s32.totalorder %s75_s11, 0  ;;  %p916_p1 = por %p91_p12, %p90_p11 }
  0x22   : > { %s921_s13 = scalar_select %p48_p13, %s774_s24, %s50_s5  }
  0x23   : > { %s1087_s12 = scalar_select %p916_p1, 1, 0 }
  0x24   : > { %s924_s14 = scalar_select %p78_p0, %s762_s21, %s80_s8  }
  0x25   : > { %p97_p3 = scmp.eq.s32.totalorder %s488_s30, 31  ;;  %p527_p4 = scmp.lt.s32.totalorder %s794_s28, 32 }
  0x26   : > { %s117_s16 = sand.u32 1, %s774_s24   ;;  %s492_s18 = sshll.u32 %s790_s27, 6 }
  0x27   : > { %p929_p5 = por %p97_p3, %p96_p2  ;;  %s491_s17 = sshll.u32 %s117_s16, 2 }
  0x28   : > { %s938_s7 = scalar_lea.hbm %s1082_s1, %s492_s18  ;;  %s121_s5 = scalar_lea.vmem [#allocation4], %s491_s17 }
  0x29   : > { %s1088_s15 = scalar_select %p929_p5, 1, 0 }
  0x2a   : > { %s129_s8 = sshll.u32 %s121_s5, 4  ;;  %p944_p7 = pnand %p527_p4, %p898_p6  ;;  %s940_s8 = int_to_ptr.vmem [resolvable:$true] %s129_s8 }
  0x2b   : > { %s118_s10 = scalar_lea.sflag [#allocation5], %s117_s16  ;;  %s640_s11 = scalar_lea.hbm %s938_s7, 64 }
  0x2c   : > { %p641_p11 = scmp.ne.s32.totalorder %s938_s7, %s640_s11  ;;  %p642_p12 = pneg %p944_p7 }
  0x2d   : > { %s645_s6 = scalar_lea.hbm %s1082_s1, 128  ;;  %p646_p6 = scmp.lt.u32.totalorder %s938_s7, %s1082_s1 }
  0x2e   : > { %p643_p13 = pnand %p642_p12, %p641_p11  ;;  %p647_p2 = scmp.lt.u32.totalorder %s645_s6, %s640_s11 }
  0x2f   : > { %p649_p4 = scmp.lt.u32.totalorder %s640_s11, %s938_s7 }
  0x30   : > { %p644_p0 = pneg %p643_p13  ;;  %p648_p3 = por %p647_p2, %p646_p6 }
  0x32   : > { %p650_p8 = por %p649_p4, %p648_p3 }
  0x34   : > { %p651_p9 = pnand %p650_p8, %p644_p0 }
  0x36   : > { %654 = shalt.err (!%p651_p9)
}
  0x37   : > { %s655_s16 = scalar_lea.vmem %s940_s8, 64  ;;  %s797_s5 = smov [#allocation4]  }
  0x38   : > { %p656_p11 = scmp.ne.s32.totalorder %s940_s8, %s655_s16  ;;  %s660_s17 = sshll.u32 %s797_s5, 4  ;;  %s661_s17 = int_to_ptr.vmem [resolvable:$false] %s660_s17 }
  0x39   : > { %s662_s18 = scalar_lea.vmem %s661_s17, 128  ;;  %p663_p1 = scmp.lt.s32.totalorder %s940_s8, %s661_s17 }
  0x3a   : > { %p658_p13 = pnand %p656_p11, %p642_p12  ;;  %p664_p6 = scmp.lt.s32.totalorder %s662_s18, %s655_s16 }
  0x3c   : > { %p659_p5 = pneg %p658_p13  ;;  %p665_p2 = por %p664_p6, %p663_p1 }
  0x3e   : > { %p666_p3 = pnand %p665_p2, %p659_p5 }
  0x40   : > { %669 = shalt.err (!%p666_p3)
}
  0x41   : > { %522 = dma.hbm_to_vmem [thread:$0]  (!%p944_p7), %s938_s7, 64, %s940_s8, %s118_s10  }
  0x42   : > { %p1090_p8 = scmp.lt.s32.totalorder %s794_s28, 33  ;;  %p1091_p9 = scmp.ge.s32.totalorder %s794_s28, 1 }
  0x44   : > { %p135_p12 = pnand %p1091_p9, %p1090_p8 }
  0x45   : > { %s140_s11 = sand.u32 (!%p135_p12), 1, %s770_s23  }
  0x46   : > { %138 = sbr.rel (%p135_p12) target bundleno = 182 (0xb6), region = 24  ;;  %s494_s6 = sshll.u32 (!%p135_p12), %s140_s11, 2 }
  0x47   : > { %s141_s22 = scalar_lea.sflag (!%p135_p12), [#allocation5], %s140_s11  ;;  %s144_s29 = scalar_lea.vmem (!%p135_p12), [#allocation4], %s494_s6 }
  0x4d   : > { %745 = dma.done.wait (%p908_p10), %s141_s22, 64  }
  0x4e   : > { %747 = vsyncadd (%p908_p10), %s141_s22, 4294967232  ;;  %s164_s30 = sld [smem:[#allocation3 + %s778_s0]]  ;;  %v165_v0 = vld [vmem:[%s144_s29] sm:$0xf]  ;;  %v798_v14 = vmov 683565275  }
  0x4f   : > { %v799_v16 = vmov 2475754826   ;;  %v800_v18 = vmov 2131351028   ;;  %v801_v20 = vmov 2102212464  }
  0x50   : > { %v802_v22 = vmov 920167782   ;;  %v803_v29 = vmov 1326507024   ;;  %s160_s9 = sand.u32 1, %s758_s20   ;;  %s506_s8 = sshll.u32 %s778_s0, 1 }
  0x51   : > { %s495_s7 = sshll.u32 %s160_s9, 3  ;;  %s507_s10 = sshll.u32 %s782_s25, 5 }
  0x52   : > { %s392_s16 = sadd.s32 %s507_s10, %s506_s8  ;;  %s162_s5 = scalar_lea.vmem [#allocation7], %s495_s7 }
  0x53   : > { %s395_s17 = sshll.u32 %s162_s5, 4  ;;  %s508_s18 = sshll.u32 %s392_s16, 6  ;;  %s1011_s17 = int_to_ptr.vmem [resolvable:$true] %s395_s17 }
  0x54   : > { %v166_v1 = vstv %s164_s30  ;;  %s1016_s11 = scalar_lea.hbm %s1083_s2, %s508_s18  ;;  %s1020_s6 = scalar_lea.sflag [#allocation6], %s160_s9 }
  0x55   : > { %v985_v2 = vmul.f32 %v166_v1, %v165_v0  ;;  %s670_s22 = scalar_lea.vmem %s1011_s17, 128  ;;  %p1092_p1 = scmp.ne.s32.totalorder %s1087_s12, 0 }
  0x56   : > { %p671_p10 = scmp.ne.s32.totalorder %s1011_s17, %s670_s22  ;;  %s804_s29 = smov [#allocation7]  }
  0x57   : > { %v171_v3 = vand.u32 2139095040, %v985_v2  ;;  %v168_v5 = vand.u32 2147483647, %v985_v2  ;;  %vm170_vm7 = vcmp.lt.s32.totalorder %v985_v2, 0  ;;  %vm260_vm15 = vweird.f32 %v985_v2  ;;  %s674_s30 = sshll.u32 %s804_s29, 4  ;;  %s675_s30 = int_to_ptr.vmem [resolvable:$false] %s674_s30 }
  0x58   : > { %p672_p5 = pnand %p671_p10, %p1092_p1  ;;  %s676_s7 = scalar_lea.vmem %s675_s30, 256 }
  0x59   : > { %v172_v4 = vshrl.u32 %v171_v3, 23  ;;  %v175_v8 = vand.u32 8388607, %v168_v5  ;;  %vm169_vm8 = vcmp.le.f32.partialorder %v168_v5, 0.7853982  ;;  %p677_p0 = scmp.lt.s32.totalorder %s1011_s17, %s675_s30  ;;  %p678_p4 = scmp.lt.s32.totalorder %s676_s7, %s670_s22 }
  0x5a   : > { %p673_p7 = pneg %p672_p5 }
  0x5b   : > { %v496_v6 = vadd.s32 4294967169, %v172_v4  ;;  %v176_v12 = vor.u32 8388608, %v175_v8  ;;  %p679_p11 = por %p678_p4, %p677_p0 }
  0x5d   : > { %v178_v7 = vadd.s32 1, %v496_v6  ;;  %v216_v31 = vshll.u32 %v176_v12, 8  ;;  %p680_p13 = pnand %p679_p11, %p673_p7 }
  0x5f   : > { %vm179_vm0 = vcmp.gt.s32.totalorder %v178_v7, 0 }
  0x60   : > { %v180_v9 = vsel %vm179_vm0, %v178_v7, 0 }
  0x61   : > { %v182_v10 = vand.u32 31, %v180_v9  ;;  %v181_v11 = vshrl.u32 %v180_v9, 5 }
  0x63   : > { %v183_v13 = vsub.s32 32, %v182_v10  ;;  %v185_v15 = vshll.u32 %v798_v14, %v182_v10  ;;  %v188_v17 = vshll.u32 %v799_v16, %v182_v10  ;;  %v191_v19 = vshll.u32 %v800_v18, %v182_v10 }
  0x64   : > { %v194_v21 = vshll.u32 %v801_v20, %v182_v10  ;;  %v197_v23 = vshll.u32 %v802_v22, %v182_v10  ;;  %vm200_vm1 = vcmp.lt.s32.totalorder %v181_v11, 1  ;;  %vm203_vm2 = vcmp.lt.s32.totalorder %v181_v11, 4 }
  0x65   : > { %v184_v24 = vshrl.u32 %v798_v14, %v183_v13  ;;  %v186_v25 = vshrl.u32 %v799_v16, %v183_v13  ;;  %v189_v26 = vshrl.u32 %v800_v18, %v183_v13  ;;  %v192_v27 = vshrl.u32 %v801_v20, %v183_v13 }
  0x66   : > { %v195_v28 = vshrl.u32 %v802_v22, %v183_v13  ;;  %v198_v30 = vshrl.u32 %v803_v29, %v183_v13  ;;  %vm201_vm3 = vcmp.lt.s32.totalorder %v181_v11, 2  ;;  %vm202_vm4 = vcmp.lt.s32.totalorder %v181_v11, 3 }
  0x67   : > { %v187_v32 = vor.u32 %v186_v25, %v185_v15  ;;  %v190_v33 = vor.u32 %v189_v26, %v188_v17  ;;  %v193_v34 = vor.u32 %v192_v27, %v191_v19 }
  0x68   : > { %v196_v35 = vor.u32 %v195_v28, %v194_v21  ;;  %v199_v36 = vor.u32 %v198_v30, %v197_v23 }
  0x69   : > { %v204_v37 = vsel %vm200_vm1, %v184_v24, %v187_v32  ;;  %v205_v38 = vsel %vm203_vm2, %v193_v34, 2102212464  ;;  %v208_v39 = vsel %vm200_vm1, %v187_v32, %v190_v33  ;;  %v212_v40 = vsel %vm200_vm1, %v190_v33, %v193_v34 }
  0x6a   : > { %v206_v41 = vsel %vm202_vm4, %v190_v33, %v205_v38  ;;  %v209_v42 = vsel %vm203_vm2, %v196_v35, 920167782  ;;  %v213_v43 = vsel %vm203_vm2, %v199_v36, 1326507024 }
  0x6b   : > { %v210_v44 = vsel %vm202_vm4, %v193_v34, %v209_v42  ;;  %v214_v45 = vsel %vm202_vm4, %v196_v35, %v213_v43  ;;  %v207_v46 = vsel %vm201_vm3, %v204_v37, %v206_v41 }
  0x6c   : > { %v211_v47 = vsel %vm201_vm3, %v208_v39, %v210_v44  ;;  %v215_v48 = vsel %vm201_vm3, %v212_v40, %v214_v45  ;;  %v223_v53 = vmul.u32 %v216_v31, %v207_v46 }
  0x6d   : > { %v991_v49 = vmul.u32.u64.low %v216_v31, %v215_v48  ;;  %v992_v50 = vmul.u32.u64.high %v216_v31, %v215_v48, %v991_v49  ;;  %v994_v51 = vmul.u32.u64.low %v216_v31, %v211_v47  ;;  %v995_v52 = vmul.u32.u64.high %v216_v31, %v211_v47, %v994_v51 }
  0x6f   : > { %vm225_vm5 = vc.u32 %v992_v50, %v994_v51  ;;  %v226_v54 = vadd.s32 1, %v995_v52  ;;  %v224_v1 = vadd.s32 %v994_v51, %v992_v50 }
  0x71   : > { %v227_v55 = vsel %vm225_vm5, %v226_v54, %v995_v52 }
  0x72   : > { %v228_v56 = vadd.s32 %v227_v55, %v223_v53 }
  0x74   : > { %v229_v57 = vadd.s32 536870912, %v228_v56 }
  0x76   : > { %v230_v58 = vshrl.u32 %v229_v57, 30 }
  0x78   : > { %v231_v59 = vshll.u32 %v230_v58, 30  ;;  %v254_v15 = vsub.s32 4, %v230_v58 }
  0x7a   : > { %v232_v60 = vsub.s32 %v228_v56, %v231_v59  ;;  %v255_v18 = vsel %vm170_vm7, %v254_v15, %v230_v58 }
  0x7b   : > { %v257_v21 = vsel %vm169_vm8, 0, %v255_v18 }
  0x7c   : > { %v234_v61 = vsub.s32 0, %v232_v60  ;;  %v261_v22 = vadd.s32 3, %v257_v21  ;;  %v366_v24 = vand.u32 3, %v257_v21 }
  0x7e   : > { %v497_v62 = vmin.u32 %v234_v61, %v232_v60  ;;  %v262_v23 = vand.u32 3, %v261_v22  ;;  %vm371_vm10 = vcmp.eq.s32.totalorder %v366_v24, 2  ;;  %vm368_vm12 = vcmp.eq.s32.totalorder %v366_v24, 0 }
  0x7f   : > { %vm367_vm14 = vcmp.lt.s32.totalorder %v366_v24, 2 }
  0x80   : > { %v236_v63 = vclz %v497_v62  ;;  %vm267_vm9 = vcmp.eq.s32.totalorder %v262_v23, 2  ;;  %vm264_vm11 = vcmp.eq.s32.totalorder %v262_v23, 0  ;;  %vm263_vm13 = vcmp.lt.s32.totalorder %v262_v23, 2 }
  0x82   : > { %v498_v0 = vadd.s32 4294967294, %v236_v63 }
  0x84   : > { %vm499_vm6 = vcmp.lt.s32.totalorder %v498_v0, 0 }
  0x85   : > { %v239_v3 = vsel %vm499_vm6, 0, %v498_v0 }
  0x86   : > { %v240_v4 = vsub.s32 32, %v239_v3  ;;  %v241_v6 = vshll.u32 %v232_v60, %v239_v3  ;;  %v244_v7 = vsub.s32 4294967266, %v239_v3 }
  0x88   : > { %v242_v8 = vshrl.u32 %v224_v1, %v240_v4  ;;  %v245_v9 = vadd.s32 127, %v244_v7 }
  0x8a   : > { %v243_v10 = vor.u32 %v242_v8, %v241_v6  ;;  %v246_v11 = vshll.u32 %v245_v9, 23 }
  0x8c   : > { %v247_v12 = vor.u32 4788187, %v246_v11  ;;  %v250_v13 = vcvt.s32.f32 %v243_v10 }
  0x8e   : > { %v248_v14 = vand.u32 2147483647, %v247_v12 }
  0x90   : > { %v251_v16 = vmul.f32 %v250_v13, %v248_v14 }
  0x92   : > { %v252_v17 = vxor.u32 2147483648, %v251_v16 }
  0x94   : > { %v253_v19 = vsel %vm170_vm7, %v252_v17, %v251_v16 }
  0x95   : > { %v256_v20 = vsel %vm169_vm8, %v985_v2, %v253_v19 }
  0x96   : > { %626 = vcosq.f32 %v256_v20 }
  0x97   : > { %628 = vsinq.f32 %v256_v20 }
  0xa0   : > { %v627_v25 = vpop.eup %626 }
  0xa1   : > { %v629_v5 = vpop.eup %628  ;;  %v268_v26 = vxor.u32 2147483648, %v627_v25 }
  0xa2   : > { %v265_v27 = vxor.u32 2147483648, %v629_v5 }
  0xa3   : > { %v269_v28 = vsel %vm267_vm9, %v268_v26, %v629_v5  ;;  %v373_v29 = vsel %vm371_vm10, %v268_v26, %v629_v5 }
  0xa4   : > { %v266_v30 = vsel %vm264_vm11, %v627_v25, %v265_v27  ;;  %v370_v31 = vsel %vm368_vm12, %v627_v25, %v265_v27 }
  0xa5   : > { %v270_v32 = vsel %vm263_vm13, %v266_v30, %v269_v28  ;;  %v374_v33 = vsel %vm367_vm14, %v370_v31, %v373_v29 }
  0xa6   : > { %v271_v34 = vsel %vm260_vm15, nan, %v270_v32  ;;  %v375_v35 = vsel %vm260_vm15, nan, %v374_v33 }
  0xa7   : > { %272 = vst [vmem:[%s162_s5] sm:$0xf] %v271_v34  ;;  %504 = vst [vmem:[%s162_s5 + $0x4] sm:$0xf] %v375_v35 }
  0xa8   : > { %683 = shalt.err (!%p680_p13)
}
  0xa9   : > { %s684_s9 = scalar_lea.hbm %s1016_s11, 128  ;;  %s688_s16 = scalar_lea.hbm %s1083_s2, 4096 }
  0xaa   : > { %p685_p6 = scmp.ne.s32.totalorder %s1016_s11, %s684_s9  ;;  %p689_p8 = scmp.lt.u32.totalorder %s1016_s11, %s1083_s2 }
  0xab   : > { %p690_p9 = scmp.lt.u32.totalorder %s688_s16, %s684_s9  ;;  %p692_p10 = scmp.lt.u32.totalorder %s684_s9, %s1016_s11 }
  0xac   : > { %p686_p2 = pnand %p685_p6, %p1092_p1 }
  0xad   : > { %p691_p12 = por %p690_p9, %p689_p8 }
  0xae   : > { %p687_p3 = pneg %p686_p2 }
  0xaf   : > { %p693_p5 = por %p692_p10, %p691_p12 }
  0xb1   : > { %p694_p7 = pnand %p693_p5, %p687_p3 }
  0xb3   : > { %697 = shalt.err (!%p694_p7)
}
  0xb4   : > { %s805_s0 = smov 64   ;;  %s806_s25 = smov 4  }
  0xb5   : > { %517 = dma.vmem_to_hbm [thread:$0]  (%p1092_p1), %s1011_s17, 128, %s1016_s11, %s1020_s6, %s805_s0, %s805_s0, %s806_s25  }
  0xb6 PF: > { %p528_p0 = scmp.ge.s32.totalorder %s794_s28, 2  ;;  %s410_s22 = sand.u32 1, %s754_s19  }
  0xb7   : > { %p1093_p4 = scmp.ne.s32.totalorder %s1088_s15, 0  ;;  %s411_s29 = scalar_lea.sflag [#allocation6], %s410_s22 }
  0xb9   : > { %p524_p11 = pnand %p528_p0, %p1093_p4 }
  0xbb   : > { %749 = dma.done.wait (!%p524_p11), %s411_s29, 128  }
  0xbc   : > { %751 = vsyncadd (!%p524_p11), %s411_s29, 4294967168  ;;  %s22_s28 = sadd.s32 1, %s794_s28   ;;  %s1094_s19 = smov %s758_s20 }
  0xbd   : > { %p19_p13 = scmp.ge.s32.totalorder %s22_s28, 34   ;;  %s1095_s20 = smov %s762_s21 }
  0xbe   : > { %s1096_s21 = smov %s924_s14  ;;  %s1097_s22 = smov %s770_s23 }
  0xbf   : > { %s1098_s23 = smov %s774_s24  ;;  %s1099_s24 = smov %s921_s13 }
  0xc0   : > { %s1100_s0 = smov %s786_s26  ;;  %s1101_s25 = smov %s790_s27 }
  0xc1   : > { %s1102_s26 = smov %s1105_s3  ;;  %s1103_s27 = smov %s1109_s4 }
  0xc2   :  { %21 = sbr.rel (!%p19_p13) target bundleno = 21 (0x15), region = 70 }
  0xc9   :  { %416 = vsyncpa [#allocation5], 1 }
  0xca   :  { %418 = vsyncpa [#allocation5 + $0x1], 1 }
  0xcb   :  { %419 = vsyncpa [#allocation6], 1 }
  0xcc   :  { %421 = vsyncpa [#allocation6 + $0x1], 1 }

</bundles_post_ra>
